<compile_context>
chip_gen: v6e
topology: v6e:2x2x1
jax: 0.10.0
libtpu: 0.0.40
codegen_flags: <defaults>
</compile_context>

<pallas_src>
import functools

import jax
import jax.numpy as jnp
from jax import lax
from jax.experimental import pallas as pl
from jax.experimental.pallas import tpu as pltpu


def _round_up(x, m):
    return (x + m - 1) // m * m


def make_ncf_kernel(layers_num):
    n_tower = 2 * (layers_num - 1)

    def ncf_kernel(*refs):
        # refs layout:
        #   [user_idx (SMEM), item_idx (SMEM),
        #    user_table (HBM), item_table (HBM),
        #    w0_u, w0_i, b0, (w_l, b_l) * (layers_num - 1),
        #    wp_gmf_row, wp_mlp_row, bp,
        #    out,
        #    ubuf, ibuf, sem]
        uidx_ref, iidx_ref, utbl_ref, itbl_ref = refs[:4]
        w0u_ref, w0i_ref, b0_ref = refs[4:7]
        tower = refs[7:7 + n_tower]
        wp_gmf_ref, wp_mlp_ref, bp_ref = refs[7 + n_tower:10 + n_tower]
        out_ref = refs[10 + n_tower]
        ubuf_ref, ibuf_ref, sem_ref = refs[11 + n_tower:]

        TB, D = ubuf_ref.shape
        ME = w0u_ref.shape[0]
        base = pl.program_id(0) * TB

        # ---- fused embedding gather: per-row DMA from the HBM tables ----
        # Windowed issue/wait: at most `lag` rows (2 DMAs each) in flight.
        # Waits are byte-counted against the same semaphores, so by the end
        # of the loop every issued copy has completed.
        lag = min(TB, 128)

        def gather_step(r, carry):
            @pl.when(r < TB)
            def _issue():
                u = uidx_ref[base + r]
                it = iidx_ref[base + r]
                pltpu.make_async_copy(
                    utbl_ref.at[pl.ds(u, 1), :],
                    ubuf_ref.at[pl.ds(r, 1), :],
                    sem_ref.at[0]).start()
                pltpu.make_async_copy(
                    itbl_ref.at[pl.ds(it, 1), :],
                    ibuf_ref.at[pl.ds(r, 1), :],
                    sem_ref.at[1]).start()

            @pl.when(r >= lag)
            def _drain():
                # Descriptors only carry the byte count for the wait.
                pltpu.make_async_copy(
                    utbl_ref.at[pl.ds(0, 1), :],
                    ubuf_ref.at[pl.ds(0, 1), :],
                    sem_ref.at[0]).wait()
                pltpu.make_async_copy(
                    itbl_ref.at[pl.ds(0, 1), :],
                    ibuf_ref.at[pl.ds(0, 1), :],
                    sem_ref.at[1]).wait()

            return carry

        lax.fori_loop(0, TB + lag, gather_step, 0)

        u_rows = ubuf_ref[...]      # (TB, D) f32, layout [mlp | gmf]
        i_rows = ibuf_ref[...]

        # ---- GMF branch: hadamard product in f32 (VPU) ----
        gmf = u_rows[:, ME:] * i_rows[:, ME:]                     # (TB, E)

        # ---- MLP branch ----
        # First layer with the concat folded in as a split matmul (bf16 MXU
        # operands, f32 accumulation).
        h = (jnp.dot(u_rows[:, :ME].astype(jnp.bfloat16), w0u_ref[...],
                     preferred_element_type=jnp.float32)
             + jnp.dot(i_rows[:, :ME].astype(jnp.bfloat16), w0i_ref[...],
                       preferred_element_type=jnp.float32)
             + b0_ref[...])
        h = jnp.maximum(h, 0.0)

        # Remaining tower layers: Linear -> ReLU.
        for li in range(layers_num - 1):
            w_ref = tower[2 * li]
            b_ref = tower[2 * li + 1]
            h = jnp.maximum(
                jnp.dot(h.astype(w_ref.dtype), w_ref[...],
                        preferred_element_type=jnp.float32) + b_ref[...],
                0.0)

        # ---- predict layer over concat([gmf, h], -1) ----
        # VPU multiplies + lane reduces (no N=1 MXU matmul), stored as a
        # dense (8, TB//8) block.
        score = (jnp.sum(gmf * wp_gmf_ref[...], axis=-1)
                 + jnp.sum(h * wp_mlp_ref[...], axis=-1))          # (TB,)
        out_ref[...] = score.reshape(out_ref.shape) + bp_ref[...]

    return ncf_kernel


def init_ncf_params(key, user_num, item_num, embedding_dim, layers_num):
    E = embedding_dim
    ME = E * 2 ** (layers_num - 1)
    keys = jax.random.split(key, 6 + 2 * layers_num)

    gmf_user = jax.random.normal(keys[0], (user_num, E), jnp.float32)
    gmf_item = jax.random.normal(keys[1], (item_num, E), jnp.float32)
    mlp_user = jax.random.normal(keys[2], (user_num, ME), jnp.float32)
    mlp_item = jax.random.normal(keys[3], (item_num, ME), jnp.float32)

    params = {
        # Merged per-entity tables, layout [mlp | gmf] on the last axis.
        "user_table": jnp.concatenate([mlp_user, gmf_user], axis=-1),
        "item_table": jnp.concatenate([mlp_item, gmf_item], axis=-1),
    }

    # MLP tower: layer i maps embedding_dim * 2**(layers_num - i) -> half.
    mlp_w, mlp_b = [], []
    for i in range(layers_num):
        in_size = E * 2 ** (layers_num - i)
        out_size = in_size // 2
        scale = (6.0 / (in_size + out_size)) ** 0.5   # xavier-uniform-ish
        w = jax.random.uniform(keys[4 + 2 * i], (in_size, out_size),
                               jnp.float32, -scale, scale).astype(jnp.bfloat16)
        b = jax.random.uniform(keys[5 + 2 * i], (1, out_size),
                               jnp.float32, -0.1, 0.1)
        mlp_w.append(w)
        mlp_b.append(b)
    params["mlp_w"] = mlp_w
    params["mlp_b"] = mlp_b

    # predict layer: (2*embedding_dim) -> 1
    pin = 2 * E
    pscale = (1.0 / pin) ** 0.5
    params["wp"] = jax.random.uniform(keys[4 + 2 * layers_num], (pin, 1),
                                      jnp.float32, -pscale, pscale)
    params["bp"] = jnp.full((1, 1), 0.1, jnp.float32)
    return params


@functools.partial(jax.jit, static_argnames=("layers_num", "tile_b"))
def ncf_forward(user, item, params, layers_num, tile_b=1024):
    user = user.astype(jnp.int32)
    item = item.astype(jnp.int32)
    B = user.shape[0]

    user_tbl = params["user_table"]
    item_tbl = params["item_table"]
    D = user_tbl.shape[-1]
    E = params["wp"].shape[0] // 2
    ME = D - E

    # Batch tile: multiple of 8 (sublanes). Default 1024; raise to 2048-4096
    # on v6e / (with care) v7x via tile_b.
    TB = _round_up(min(int(tile_b), _round_up(B, 8)), 8)
    B_pad = _round_up(B, TB)
    num_tiles = B_pad // TB

    if B_pad != B:
        # Pad with index 0 (a valid row) so padded gathers never DMA OOB;
        # the padded scores are sliced off below.
        user = jnp.pad(user, (0, B_pad - B))
        item = jnp.pad(item, (0, B_pad - B))

    w0 = params["mlp_w"][0]
    w0_u, w0_i = w0[:ME], w0[ME:]                      # folded-concat split
    wp_gmf = params["wp"][:E].reshape(1, E).astype(jnp.float32)
    wp_mlp = params["wp"][E:].reshape(1, E).astype(jnp.float32)

    weight_inputs = [w0_u, w0_i, params["mlp_b"][0]]
    for w, b in zip(params["mlp_w"][1:], params["mlp_b"][1:]):
        weight_inputs += [w, b]
    weight_inputs += [wp_gmf, wp_mlp, params["bp"]]

    def resident_spec(a):
        # Weights stay VMEM-resident across grid steps (constant block idx).
        return pl.BlockSpec(a.shape, lambda *_: (0, 0))

    # Explicit scoped-VMEM budget (v5e default is 16 MiB; v7x has only
    # 64 MiB physical): gather buffers + 2x resident weights + f32
    # intermediates, with 2x headroom, clamped to [32 MiB, 48 MiB].
    weight_bytes = sum(int(a.size) * a.dtype.itemsize for a in weight_inputs)
    max_feat = max([D] + [w.shape[1] for w in params["mlp_w"]])
    vmem_est = (2 * TB * D * 4 + 2 * weight_bytes
                + 6 * TB * max_feat * 4 + 2 * 8 * (TB // 8) * 4)
    vmem_limit = int(min(max(2 * vmem_est, 32 * 1024 * 1024),
                         48 * 1024 * 1024))

    flops = B_pad * (2 * 2 * ME * w0.shape[1]
                     + sum(2 * w.shape[0] * w.shape[1]
                           for w in params["mlp_w"][1:])
                     + 6 * E)
    bytes_accessed = (2 * B_pad * D * 4      # gathered table rows
                      + weight_bytes
                      + B_pad * 4            # output
                      + 2 * B_pad * 4)       # index vectors
    cost = pl.CostEstimate(flops=int(flops), transcendentals=0,
                           bytes_accessed=int(bytes_accessed))

    grid_spec = pltpu.PrefetchScalarGridSpec(
        num_scalar_prefetch=2,               # user_idx, item_idx -> SMEM
        grid=(num_tiles,),
        in_specs=[pl.BlockSpec(memory_space=pl.ANY),     # user table (HBM)
                  pl.BlockSpec(memory_space=pl.ANY)]     # item table (HBM)
                 + [resident_spec(a) for a in weight_inputs],
        out_specs=pl.BlockSpec((8, TB // 8), lambda i, *_: (i, 0)),
        scratch_shapes=[
            pltpu.VMEM((TB, D), jnp.float32),            # gathered user rows
            pltpu.VMEM((TB, D), jnp.float32),            # gathered item rows
            pltpu.SemaphoreType.DMA((2,)),
        ],
    )

    out = pl.pallas_call(
        make_ncf_kernel(layers_num),
        out_shape=jax.ShapeDtypeStruct((num_tiles * 8, TB // 8), jnp.float32),
        grid_spec=grid_spec,
        compiler_params=pltpu.CompilerParams(
            dimension_semantics=("parallel",),
            vmem_limit_bytes=vmem_limit,
        ),
        cost_estimate=cost,
    )(user, item, user_tbl, item_tbl, *weight_inputs)

    # Dense (num_tiles*8, TB//8) slab -> flat per-row scores -> drop padding.
    return out.reshape(-1)[:B]


def ncf_reference(user, item, params, layers_num):
    del layers_num
    E = params["wp"].shape[0] // 2
    u = params["user_table"][user]
    it = params["item_table"][item]
    ME = u.shape[-1] - E
    gmf = u[:, ME:] * it[:, ME:]
    h = jnp.concatenate([u[:, :ME], it[:, :ME]], axis=-1)
    for w, b in zip(params["mlp_w"], params["mlp_b"]):
        h = jnp.maximum(
            jnp.dot(h.astype(w.dtype), w, preferred_element_type=jnp.float32)
            + b, 0.0)
    cat = jnp.concatenate([gmf, h], axis=-1)
    score = jnp.sum(cat * params["wp"].reshape(1, -1), axis=-1)
    return score + params["bp"][0, 0]


if __name__ == "__main__":
    user_num, item_num = 10, 12
    embedding_dim = 8
    layers_num = 3
    batch = 8

    key = jax.random.PRNGKey(0)
    kp, ku, ki = jax.random.split(key, 3)
    params = init_ncf_params(kp, user_num, item_num, embedding_dim, layers_num)

    user = jax.random.randint(ku, (batch,), 0, user_num, dtype=jnp.int32)
    item = jax.random.randint(ki, (batch,), 0, item_num, dtype=jnp.int32)

    out = ncf_forward(user, item, params, layers_num)
    out = jax.block_until_ready(out)

    ref = ncf_reference(user, item, params, layers_num)
    assert out.shape == (batch,), out.shape
    assert jnp.allclose(out, ref, atol=2e-3, rtol=2e-3), (out, ref)

    print("KERNEL_OK")
</pallas_src>

<mosaic_0001>
module attributes {stable_mosaic.version = 11 : i64} {
  func.func @ncf_kernel(%arg0: i32, %arg1: memref<8xi32, #tpu.memory_space<smem>>, %arg2: memref<8xi32, #tpu.memory_space<smem>>, %arg3: memref<10x40xf32, #tpu.memory_space<any>>, %arg4: memref<12x40xf32, #tpu.memory_space<any>>, %arg5: memref<32x32xbf16, #tpu.memory_space<vmem>>, %arg6: memref<32x32xbf16, #tpu.memory_space<vmem>>, %arg7: memref<1x32xf32, #tpu.memory_space<vmem>>, %arg8: memref<32x16xbf16, #tpu.memory_space<vmem>>, %arg9: memref<1x16xf32, #tpu.memory_space<vmem>>, %arg10: memref<16x8xbf16, #tpu.memory_space<vmem>>, %arg11: memref<1x8xf32, #tpu.memory_space<vmem>>, %arg12: memref<1x8xf32, #tpu.memory_space<vmem>>, %arg13: memref<1x8xf32, #tpu.memory_space<vmem>>, %arg14: memref<1x1xf32, #tpu.memory_space<vmem>>, %arg15: memref<8x1xf32, #tpu.memory_space<vmem>>, %arg16: memref<8x40xf32, #tpu.memory_space<vmem>>, %arg17: memref<8x40xf32, #tpu.memory_space<vmem>>, %arg18: memref<2x!tpu.dma_semaphore, #tpu.memory_space<semaphore_mem>>) attributes {dimension_semantics = [#tpu.dimension_semantics<parallel>], iteration_bounds = array<i64: 1>, scalar_prefetch = 2 : i64, scratch_operands = 3 : i64, tpu.core_type = #tpu.core_type<tc>, window_params = [{}, {}, {pipeline_mode = #tpu.pipeline_mode<synchronous>, transform_indices = @transform_2, window_bounds = array<i64: 32, 32>}, {pipeline_mode = #tpu.pipeline_mode<synchronous>, transform_indices = @transform_3, window_bounds = array<i64: 32, 32>}, {pipeline_mode = #tpu.pipeline_mode<synchronous>, transform_indices = @transform_4, window_bounds = array<i64: 1, 32>}, {pipeline_mode = #tpu.pipeline_mode<synchronous>, transform_indices = @transform_5, window_bounds = array<i64: 32, 16>}, {pipeline_mode = #tpu.pipeline_mode<synchronous>, transform_indices = @transform_6, window_bounds = array<i64: 1, 16>}, {pipeline_mode = #tpu.pipeline_mode<synchronous>, transform_indices = @transform_7, window_bounds = array<i64: 16, 8>}, {pipeline_mode = #tpu.pipeline_mode<synchronous>, transform_indices = @transform_8, window_bounds = array<i64: 1, 8>}, {pipeline_mode = #tpu.pipeline_mode<synchronous>, transform_indices = @transform_9, window_bounds = array<i64: 1, 8>}, {pipeline_mode = #tpu.pipeline_mode<synchronous>, transform_indices = @transform_10, window_bounds = array<i64: 1, 8>}, {pipeline_mode = #tpu.pipeline_mode<synchronous>, transform_indices = @transform_11, window_bounds = array<i64: 1, 1>}, {transform_indices = @transform_12, window_bounds = array<i64: 8, 1>}]} {
    %c8_i32 = arith.constant 8 : i32
    %0 = arith.muli %arg0, %c8_i32 : i32
    %c0_i32 = arith.constant 0 : i32
    %c16_i32 = arith.constant 16 : i32
    %1 = arith.addi %c0_i32, %c16_i32 : i32
    %c1_i32 = arith.constant 1 : i32
    scf.for %arg19 = %c0_i32 to %1 step %c1_i32  : i32 {
      %c8_i32_34 = arith.constant 8 : i32
      %51 = arith.cmpi slt, %arg19, %c8_i32_34 : i32
      %52 = arith.extui %51 : i1 to i32
      %c0_i32_35 = arith.constant 0 : i32
      %53 = arith.cmpi ne, %52, %c0_i32_35 : i32
      scf.if %53 {
        %57 = arith.addi %0, %arg19 : i32
        %58 = arith.index_cast %57 : i32 to index
        %59 = memref.load %arg1[%58] : memref<8xi32, #tpu.memory_space<smem>>
        %60 = arith.addi %0, %arg19 : i32
        %61 = arith.index_cast %60 : i32 to index
        %62 = memref.load %arg2[%61] : memref<8xi32, #tpu.memory_space<smem>>
        %c0_i32_38 = arith.constant 0 : i32
        %c0_i32_39 = arith.constant 0 : i32
        %63 = tpu.memref_slice %arg3[%59, %c0_i32_39] : memref<10x40xf32, #tpu.memory_space<any>> -> memref<1x40xf32, #tpu.memory_space<any>>
        %c0_i32_40 = arith.constant 0 : i32
        %64 = tpu.memref_slice %arg16[%arg19, %c0_i32_40] : memref<8x40xf32, #tpu.memory_space<vmem>> -> memref<1x40xf32, #tpu.memory_space<vmem>>
        %65 = tpu.memref_slice %arg18[%c0_i32_38] : memref<2x!tpu.dma_semaphore, #tpu.memory_space<semaphore_mem>> -> memref<1x!tpu.dma_semaphore, #tpu.memory_space<semaphore_mem>>
        %66 = tpu.memref_squeeze %65 : memref<1x!tpu.dma_semaphore, #tpu.memory_space<semaphore_mem>> -> memref<!tpu.dma_semaphore, #tpu.memory_space<semaphore_mem>>
        tpu.enqueue_dma source(%63 : memref<1x40xf32, #tpu.memory_space<any>>) target(%64 : memref<1x40xf32, #tpu.memory_space<vmem>>) target_semaphore(%66 : memref<!tpu.dma_semaphore, #tpu.memory_space<semaphore_mem>>)
        %c1_i32_41 = arith.constant 1 : i32
        %c0_i32_42 = arith.constant 0 : i32
        %67 = tpu.memref_slice %arg4[%62, %c0_i32_42] : memref<12x40xf32, #tpu.memory_space<any>> -> memref<1x40xf32, #tpu.memory_space<any>>
        %c0_i32_43 = arith.constant 0 : i32
        %68 = tpu.memref_slice %arg17[%arg19, %c0_i32_43] : memref<8x40xf32, #tpu.memory_space<vmem>> -> memref<1x40xf32, #tpu.memory_space<vmem>>
        %69 = tpu.memref_slice %arg18[%c1_i32_41] : memref<2x!tpu.dma_semaphore, #tpu.memory_space<semaphore_mem>> -> memref<1x!tpu.dma_semaphore, #tpu.memory_space<semaphore_mem>>
        %70 = tpu.memref_squeeze %69 : memref<1x!tpu.dma_semaphore, #tpu.memory_space<semaphore_mem>> -> memref<!tpu.dma_semaphore, #tpu.memory_space<semaphore_mem>>
        tpu.enqueue_dma source(%67 : memref<1x40xf32, #tpu.memory_space<any>>) target(%68 : memref<1x40xf32, #tpu.memory_space<vmem>>) target_semaphore(%70 : memref<!tpu.dma_semaphore, #tpu.memory_space<semaphore_mem>>)
      } else {
      }
      %c8_i32_36 = arith.constant 8 : i32
      %54 = arith.cmpi sge, %arg19, %c8_i32_36 : i32
      %55 = arith.extui %54 : i1 to i32
      %c0_i32_37 = arith.constant 0 : i32
      %56 = arith.cmpi ne, %55, %c0_i32_37 : i32
      scf.if %56 {
        %c0_i32_38 = arith.constant 0 : i32
        %c0_i32_39 = arith.constant 0 : i32
        %c0_i32_40 = arith.constant 0 : i32
        %57 = tpu.memref_slice %arg3[%c0_i32_39, %c0_i32_40] : memref<10x40xf32, #tpu.memory_space<any>> -> memref<1x40xf32, #tpu.memory_space<any>>
        %c0_i32_41 = arith.constant 0 : i32
        %c0_i32_42 = arith.constant 0 : i32
        %58 = tpu.memref_slice %arg16[%c0_i32_41, %c0_i32_42] : memref<8x40xf32, #tpu.memory_space<vmem>> -> memref<1x40xf32, #tpu.memory_space<vmem>>
        %59 = tpu.memref_slice %arg18[%c0_i32_38] : memref<2x!tpu.dma_semaphore, #tpu.memory_space<semaphore_mem>> -> memref<1x!tpu.dma_semaphore, #tpu.memory_space<semaphore_mem>>
        %60 = tpu.memref_squeeze %59 : memref<1x!tpu.dma_semaphore, #tpu.memory_space<semaphore_mem>> -> memref<!tpu.dma_semaphore, #tpu.memory_space<semaphore_mem>>
        tpu.wait_dma2 semaphore(%60 : memref<!tpu.dma_semaphore, #tpu.memory_space<semaphore_mem>>) src(%57 : memref<1x40xf32, #tpu.memory_space<any>>) dst(%58 : memref<1x40xf32, #tpu.memory_space<vmem>>)
        %c1_i32_43 = arith.constant 1 : i32
        %c0_i32_44 = arith.constant 0 : i32
        %c0_i32_45 = arith.constant 0 : i32
        %61 = tpu.memref_slice %arg4[%c0_i32_44, %c0_i32_45] : memref<12x40xf32, #tpu.memory_space<any>> -> memref<1x40xf32, #tpu.memory_space<any>>
        %c0_i32_46 = arith.constant 0 : i32
        %c0_i32_47 = arith.constant 0 : i32
        %62 = tpu.memref_slice %arg17[%c0_i32_46, %c0_i32_47] : memref<8x40xf32, #tpu.memory_space<vmem>> -> memref<1x40xf32, #tpu.memory_space<vmem>>
        %63 = tpu.memref_slice %arg18[%c1_i32_43] : memref<2x!tpu.dma_semaphore, #tpu.memory_space<semaphore_mem>> -> memref<1x!tpu.dma_semaphore, #tpu.memory_space<semaphore_mem>>
        %64 = tpu.memref_squeeze %63 : memref<1x!tpu.dma_semaphore, #tpu.memory_space<semaphore_mem>> -> memref<!tpu.dma_semaphore, #tpu.memory_space<semaphore_mem>>
        tpu.wait_dma2 semaphore(%64 : memref<!tpu.dma_semaphore, #tpu.memory_space<semaphore_mem>>) src(%61 : memref<1x40xf32, #tpu.memory_space<any>>) dst(%62 : memref<1x40xf32, #tpu.memory_space<vmem>>)
      } else {
      }
    }
    %c16_i32_0 = arith.constant 16 : i32
    %c0 = arith.constant 0 : index
    %c0_1 = arith.constant 0 : index
    %2 = vector.load %arg16[%c0, %c0_1] : memref<8x40xf32, #tpu.memory_space<vmem>>, vector<8x40xf32>
    %c0_2 = arith.constant 0 : index
    %c0_3 = arith.constant 0 : index
    %3 = vector.load %arg17[%c0_2, %c0_3] : memref<8x40xf32, #tpu.memory_space<vmem>>, vector<8x40xf32>
    %4 = vector.extract_strided_slice %2 {offsets = [0, 32], sizes = [8, 8], strides = [1, 1]} : vector<8x40xf32> to vector<8x8xf32>
    %5 = vector.extract_strided_slice %3 {offsets = [0, 32], sizes = [8, 8], strides = [1, 1]} : vector<8x40xf32> to vector<8x8xf32>
    %6 = arith.mulf %4, %5 : vector<8x8xf32>
    %7 = vector.extract_strided_slice %2 {offsets = [0, 0], sizes = [8, 32], strides = [1, 1]} : vector<8x40xf32> to vector<8x32xf32>
    %8 = arith.truncf %7 : vector<8x32xf32> to vector<8x32xbf16>
    %c0_4 = arith.constant 0 : index
    %c0_5 = arith.constant 0 : index
    %9 = vector.load %arg5[%c0_4, %c0_5] : memref<32x32xbf16, #tpu.memory_space<vmem>>, vector<32x32xbf16>
    %cst = arith.constant dense<0.000000e+00> : vector<8x32xf32>
    %10 = tpu.matmul %8, %9, %cst {dimension_numbers = #tpu.dot_dimension_numbers<[1], [0], [0], [1], [0, 0, 1, 1], [], []>} : vector<8x32xbf16>, vector<32x32xbf16>, vector<8x32xf32> -> vector<8x32xf32>
    %11 = vector.extract_strided_slice %3 {offsets = [0, 0], sizes = [8, 32], strides = [1, 1]} : vector<8x40xf32> to vector<8x32xf32>
    %12 = arith.truncf %11 : vector<8x32xf32> to vector<8x32xbf16>
    %c0_6 = arith.constant 0 : index
    %c0_7 = arith.constant 0 : index
    %13 = vector.load %arg6[%c0_6, %c0_7] : memref<32x32xbf16, #tpu.memory_space<vmem>>, vector<32x32xbf16>
    %cst_8 = arith.constant dense<0.000000e+00> : vector<8x32xf32>
    %14 = tpu.matmul %12, %13, %cst_8 {dimension_numbers = #tpu.dot_dimension_numbers<[1], [0], [0], [1], [0, 0, 1, 1], [], []>} : vector<8x32xbf16>, vector<32x32xbf16>, vector<8x32xf32> -> vector<8x32xf32>
    %15 = arith.addf %10, %14 : vector<8x32xf32>
    %c0_9 = arith.constant 0 : index
    %c0_10 = arith.constant 0 : index
    %16 = vector.load %arg7[%c0_9, %c0_10] : memref<1x32xf32, #tpu.memory_space<vmem>>, vector<1x32xf32>
    %17 = vector.broadcast %16 : vector<1x32xf32> to vector<8x32xf32>
    %18 = arith.addf %15, %17 : vector<8x32xf32>
    %cst_11 = arith.constant 0.000000e+00 : f32
    %19 = vector.broadcast %cst_11 : f32 to vector<8x32xf32>
    %20 = arith.maximumf %18, %19 : vector<8x32xf32>
    %21 = arith.truncf %20 : vector<8x32xf32> to vector<8x32xbf16>
    %c0_12 = arith.constant 0 : index
    %c0_13 = arith.constant 0 : index
    %22 = vector.load %arg8[%c0_12, %c0_13] : memref<32x16xbf16, #tpu.memory_space<vmem>>, vector<32x16xbf16>
    %cst_14 = arith.constant dense<0.000000e+00> : vector<8x16xf32>
    %23 = tpu.matmul %21, %22, %cst_14 {dimension_numbers = #tpu.dot_dimension_numbers<[1], [0], [0], [1], [0, 0, 1, 1], [], []>} : vector<8x32xbf16>, vector<32x16xbf16>, vector<8x16xf32> -> vector<8x16xf32>
    %c0_15 = arith.constant 0 : index
    %c0_16 = arith.constant 0 : index
    %24 = vector.load %arg9[%c0_15, %c0_16] : memref<1x16xf32, #tpu.memory_space<vmem>>, vector<1x16xf32>
    %25 = vector.broadcast %24 : vector<1x16xf32> to vector<8x16xf32>
    %26 = arith.addf %23, %25 : vector<8x16xf32>
    %cst_17 = arith.constant 0.000000e+00 : f32
    %27 = vector.broadcast %cst_17 : f32 to vector<8x16xf32>
    %28 = arith.maximumf %26, %27 : vector<8x16xf32>
    %29 = arith.truncf %28 : vector<8x16xf32> to vector<8x16xbf16>
    %c0_18 = arith.constant 0 : index
    %c0_19 = arith.constant 0 : index
    %30 = vector.load %arg10[%c0_18, %c0_19] : memref<16x8xbf16, #tpu.memory_space<vmem>>, vector<16x8xbf16>
    %cst_20 = arith.constant dense<0.000000e+00> : vector<8x8xf32>
    %31 = tpu.matmul %29, %30, %cst_20 {dimension_numbers = #tpu.dot_dimension_numbers<[1], [0], [0], [1], [0, 0, 1, 1], [], []>} : vector<8x16xbf16>, vector<16x8xbf16>, vector<8x8xf32> -> vector<8x8xf32>
    %c0_21 = arith.constant 0 : index
    %c0_22 = arith.constant 0 : index
    %32 = vector.load %arg11[%c0_21, %c0_22] : memref<1x8xf32, #tpu.memory_space<vmem>>, vector<1x8xf32>
    %33 = vector.broadcast %32 : vector<1x8xf32> to vector<8x8xf32>
    %34 = arith.addf %31, %33 : vector<8x8xf32>
    %cst_23 = arith.constant 0.000000e+00 : f32
    %35 = vector.broadcast %cst_23 : f32 to vector<8x8xf32>
    %36 = arith.maximumf %34, %35 : vector<8x8xf32>
    %c0_24 = arith.constant 0 : index
    %c0_25 = arith.constant 0 : index
    %37 = vector.load %arg12[%c0_24, %c0_25] : memref<1x8xf32, #tpu.memory_space<vmem>>, vector<1x8xf32>
    %38 = vector.broadcast %37 : vector<1x8xf32> to vector<8x8xf32>
    %39 = arith.mulf %6, %38 : vector<8x8xf32>
    %cst_26 = arith.constant dense<0.000000e+00> : vector<8xf32>
    %40 = vector.multi_reduction <add>, %39, %cst_26 [1] : vector<8x8xf32> to vector<8xf32>
    %c0_27 = arith.constant 0 : index
    %c0_28 = arith.constant 0 : index
    %41 = vector.load %arg13[%c0_27, %c0_28] : memref<1x8xf32, #tpu.memory_space<vmem>>, vector<1x8xf32>
    %42 = vector.broadcast %41 : vector<1x8xf32> to vector<8x8xf32>
    %43 = arith.mulf %36, %42 : vector<8x8xf32>
    %cst_29 = arith.constant dense<0.000000e+00> : vector<8xf32>
    %44 = vector.multi_reduction <add>, %43, %cst_29 [1] : vector<8x8xf32> to vector<8xf32>
    %45 = arith.addf %40, %44 : vector<8xf32>
    %46 = vector.shape_cast %45 : vector<8xf32> to vector<8x1xf32>
    %c0_30 = arith.constant 0 : index
    %c0_31 = arith.constant 0 : index
    %47 = vector.load %arg14[%c0_30, %c0_31] : memref<1x1xf32, #tpu.memory_space<vmem>>, vector<1x1xf32>
    %48 = vector.broadcast %47 : vector<1x1xf32> to vector<8x1xf32>
    %49 = arith.addf %46, %48 : vector<8x1xf32>
    %c0_32 = arith.constant 0 : index
    %c0_33 = arith.constant 0 : index
    %50 = vector.load %arg15[%c0_32, %c0_33] : memref<8x1xf32, #tpu.memory_space<vmem>>, vector<8x1xf32>
    tpu.vector_store %arg15[%c0_32, %c0_33], %49 {strides = array<i32>} : memref<8x1xf32, #tpu.memory_space<vmem>>, vector<8x1xf32>,
    return
  }
  func.func @transform_2(%arg0: i32, %arg1: memref<8xi32, #tpu.memory_space<smem>>, %arg2: memref<8xi32, #tpu.memory_space<smem>>) -> (i32, i32) {
    %c0_i32 = arith.constant 0 : i32
    %c0_i32_0 = arith.constant 0 : i32
    %c0_i32_1 = arith.constant 0 : i32
    return %c0_i32, %c0_i32_0 : i32, i32
  }
  func.func @transform_3(%arg0: i32, %arg1: memref<8xi32, #tpu.memory_space<smem>>, %arg2: memref<8xi32, #tpu.memory_space<smem>>) -> (i32, i32) {
    %c0_i32 = arith.constant 0 : i32
    %c0_i32_0 = arith.constant 0 : i32
    %c0_i32_1 = arith.constant 0 : i32
    return %c0_i32, %c0_i32_0 : i32, i32
  }
  func.func @transform_4(%arg0: i32, %arg1: memref<8xi32, #tpu.memory_space<smem>>, %arg2: memref<8xi32, #tpu.memory_space<smem>>) -> (i32, i32) {
    %c0_i32 = arith.constant 0 : i32
    %c0_i32_0 = arith.constant 0 : i32
    %c0_i32_1 = arith.constant 0 : i32
    return %c0_i32, %c0_i32_0 : i32, i32
  }
  func.func @transform_5(%arg0: i32, %arg1: memref<8xi32, #tpu.memory_space<smem>>, %arg2: memref<8xi32, #tpu.memory_space<smem>>) -> (i32, i32) {
    %c0_i32 = arith.constant 0 : i32
    %c0_i32_0 = arith.constant 0 : i32
    %c0_i32_1 = arith.constant 0 : i32
    return %c0_i32, %c0_i32_0 : i32, i32
  }
  func.func @transform_6(%arg0: i32, %arg1: memref<8xi32, #tpu.memory_space<smem>>, %arg2: memref<8xi32, #tpu.memory_space<smem>>) -> (i32, i32) {
    %c0_i32 = arith.constant 0 : i32
    %c0_i32_0 = arith.constant 0 : i32
    %c0_i32_1 = arith.constant 0 : i32
    return %c0_i32, %c0_i32_0 : i32, i32
  }
  func.func @transform_7(%arg0: i32, %arg1: memref<8xi32, #tpu.memory_space<smem>>, %arg2: memref<8xi32, #tpu.memory_space<smem>>) -> (i32, i32) {
    %c0_i32 = arith.constant 0 : i32
    %c0_i32_0 = arith.constant 0 : i32
    %c0_i32_1 = arith.constant 0 : i32
    return %c0_i32, %c0_i32_0 : i32, i32
  }
  func.func @transform_8(%arg0: i32, %arg1: memref<8xi32, #tpu.memory_space<smem>>, %arg2: memref<8xi32, #tpu.memory_space<smem>>) -> (i32, i32) {
    %c0_i32 = arith.constant 0 : i32
    %c0_i32_0 = arith.constant 0 : i32
    %c0_i32_1 = arith.constant 0 : i32
    return %c0_i32, %c0_i32_0 : i32, i32
  }
  func.func @transform_9(%arg0: i32, %arg1: memref<8xi32, #tpu.memory_space<smem>>, %arg2: memref<8xi32, #tpu.memory_space<smem>>) -> (i32, i32) {
    %c0_i32 = arith.constant 0 : i32
    %c0_i32_0 = arith.constant 0 : i32
    %c0_i32_1 = arith.constant 0 : i32
    return %c0_i32, %c0_i32_0 : i32, i32
  }
  func.func @transform_10(%arg0: i32, %arg1: memref<8xi32, #tpu.memory_space<smem>>, %arg2: memref<8xi32, #tpu.memory_space<smem>>) -> (i32, i32) {
    %c0_i32 = arith.constant 0 : i32
    %c0_i32_0 = arith.constant 0 : i32
    %c0_i32_1 = arith.constant 0 : i32
    return %c0_i32, %c0_i32_0 : i32, i32
  }
  func.func @transform_11(%arg0: i32, %arg1: memref<8xi32, #tpu.memory_space<smem>>, %arg2: memref<8xi32, #tpu.memory_space<smem>>) -> (i32, i32) {
    %c0_i32 = arith.constant 0 : i32
    %c0_i32_0 = arith.constant 0 : i32
    %c0_i32_1 = arith.constant 0 : i32
    return %c0_i32, %c0_i32_0 : i32, i32
  }
  func.func @transform_12(%arg0: i32, %arg1: memref<8xi32, #tpu.memory_space<smem>>, %arg2: memref<8xi32, #tpu.memory_space<smem>>) -> (i32, i32) {
    %c0_i32 = arith.constant 0 : i32
    %c0_i32_0 = arith.constant 0 : i32
    return %arg0, %c0_i32 : i32, i32
  }
}

</mosaic_0001>

<bundles_post_ra>
// kernel: ncf_forward.1
= control target key start
LH: loop header
LB: loop body
LE: loop exit
PB: predicated region body
PF: predicated region fallthrough
CT: control target
= control target key end

     0   :  { %s797_s0 = inlined_call_operand.vmem [shape: s32[8], index: 0, kind: input, shape index: {}]   ;;  %s798_s2 = inlined_call_operand.vmem [shape: f32[10,40], index: 2, kind: input, shape index: {}]   ;;  %s799_s3 = inlined_call_operand.vmem [shape: f32[12,40], index: 3, kind: input, shape index: {}]   ;;  %s800_s4 = inlined_call_operand.vmem [shape: bf16[32,32], index: 4, kind: input, shape index: {}]   ;;  %s801_s5 = inlined_call_operand.vmem [shape: bf16[32,32], index: 5, kind: input, shape index: {}]   ;;  %s802_s6 = inlined_call_operand.vmem [shape: f32[1,32], index: 6, kind: input, shape index: {}]   ;;  %s803_s7 = inlined_call_operand.vmem [shape: bf16[32,16], index: 7, kind: input, shape index: {}]   ;;  %s804_s8 = inlined_call_operand.vmem [shape: f32[1,16], index: 8, kind: input, shape index: {}]   ;;  %s805_s9 = inlined_call_operand.vmem [shape: bf16[16,8], index: 9, kind: input, shape index: {}]   ;;  %s806_s10 = inlined_call_operand.vmem [shape: f32[1,8], index: 10, kind: input, shape index: {}]   ;;  %s807_s11 = inlined_call_operand.vmem [shape: f32[1,8], index: 11, kind: input, shape index: {}]   ;;  %s808_s12 = inlined_call_operand.vmem [shape: f32[1,8], index: 12, kind: input, shape index: {}]   ;;  %s809_s14 = inlined_call_operand.vmem [shape: f32[8,1], index: 14, kind: output, shape index: {}]   ;;  %s810_s1 = inlined_call_operand.vmem [shape: s32[8], index: 1, kind: input, shape index: {}]   ;;  %s811_s13 = inlined_call_operand.<no memory space> [shape: f32[1,1], index: 13, kind: input, shape index: {}]  }
   0x1   :  { %s19_s15 = sshll.u32 %s797_s0, 4  ;;  %s23_s18 = sshll.u32 %s810_s1, 4  ;;  %v27_v0 = vstv %s811_s13  ;;  %s20_s15 = int_to_ptr.vmem [resolvable:$true] %s19_s15  ;;  %s24_s18 = int_to_ptr.vmem [resolvable:$true] %s23_s18 }
   0x2   :  { %28 = vst [vmem:[#allocation8] sm:$0x1] %v27_v0  ;;  %s608_s21 = scalar_lea.vmem %s20_s15, 16  ;;  %p613_p1 = scmp.lt.s32.totalorder %s20_s15, %s20_s15 }
   0x3   :  { %p609_p0 = scmp.ne.s32.totalorder %s20_s15, %s608_s21  ;;  %p614_p2 = scmp.lt.s32.totalorder %s608_s21, %s608_s21 }
   0x5   :  { %p615_p3 = por %p614_p2, %p613_p1 }
   0x7   :  { %p616_p4 = pnand %p615_p3, %p609_p0 }
   0x9   :  { %619 = shalt.err (!%p616_p4)  }
   0xa   :  { %s650_s22 = smov [#allocation6]   ;;  %s620_s0 = scalar_lea.vmem %s24_s18, 16 }
   0xb   :  { %22 = dma.vmem_to_smem %s20_s15, 16, %s650_s22, [#allocation5] }
   0xc   :  { %p621_p5 = scmp.ne.s32.totalorder %s24_s18, %s620_s0  ;;  %p625_p6 = scmp.lt.s32.totalorder %s24_s18, %s24_s18 }
   0xd   :  { %p626_p7 = scmp.lt.s32.totalorder %s620_s0, %s620_s0 }
   0xf   :  { %p627_p8 = por %p626_p7, %p625_p6 }
  0x11   :  { %p628_p9 = pnand %p627_p8, %p621_p5 }
  0x13   :  { %631 = shalt.err (!%p628_p9)  }
  0x14   :  { %s651_s1 = smov [#allocation7]  }
  0x15   :  { %26 = dma.vmem_to_smem %s24_s18, 16, %s651_s1, [#allocation5] }
  0x16   :  { %636 = dma.done.wait [#allocation5], 32 }
  0x17   :  { %637 = vsyncadd [#allocation5], 4294967264 }
  0x18   :  { %30 = sfence }
  0x19   :  { %s646_s13 = smov 0  }
  0x1a LB: > { %p521_p10 = scmp.ge.s32.totalorder %s648_s13, 8  ;;  %s648_s13 = sphi %s646_s13, %s58_s13  }
  0x1b   : > { %s64_s23 = sld [smem:[#allocation6 + %s648_s13]] (!%p521_p10)  ;;  %s67_s28 = scalar_lea.vmem (!%p521_p10), [#allocation2], %s648_s13 }
  0x1c   : > { %62 = sbr.rel (%p521_p10) target bundleno = 40 (0x28), region = 52  ;;  %s65_s24 = sld [smem:[#allocation7 + %s648_s13]] (!%p521_p10) }
  0x21   : > { %s66_s27 = scalar_lea.vmem %s798_s2, %s64_s23 }
  0x22   : > { %v86_v1 = vld [vmem:[%s66_s27] sm:$0x1] }
  0x23   : > { %87 = vst [vmem:[%s67_s28] sm:$0x1] %v86_v1 }
  0x24   : > { %113 = vsyncadd [#allocation4], 16  ;;  %s114_s15 = scalar_lea.vmem %s799_s3, %s65_s24  ;;  %s115_s16 = scalar_lea.vmem [#allocation3], %s648_s13 }
  0x25   : > { %v135_v2 = vld [vmem:[%s114_s15] sm:$0x1] }
  0x26   : > { %136 = vst [vmem:[%s115_s16] sm:$0x1] %v135_v2 }
  0x27   : > { %162 = vsyncadd [#allocation4 + $0x1], 16 }
  0x28 PF: > { %639 = dma.done.wait (%p521_p10), [#allocation4], 16 }
  0x29   : > { %641 = vsyncadd (%p521_p10), [#allocation4], 4294967280 }
  0x2a   : > { %643 = dma.done.wait (%p521_p10), [#allocation4 + $0x1], 16 }
  0x2b   : > { %645 = vsyncadd (%p521_p10), [#allocation4 + $0x1], 4294967280  ;;  %s58_s13 = sadd.s32 1, %s648_s13  }
  0x2c   : > { %p55_p11 = scmp.ge.s32.totalorder %s58_s13, 16  }
  0x2d   :  { %v601_v3 = vld [vmem:[%s801_s5 + $0x8] sm:$0xff] (%p55_p11)   ;;  %v652_v4 = vmov (%p55_p11), 0.0   ;;  %v603_v6 = vld [vmem:[%s801_s5] sm:$0xff] (%p55_p11)   ;;  %vm653_vm0 = vmmov (%p55_p11), 0   ;;  %vm198_vm1 = vcmask (%p55_p11), 261120   ;;  %s654_s26 = smov (%p55_p11), 32  }
  0x2e   :  { %57 = sbr.rel (!%p55_p11) target bundleno = 26 (0x1a), region = 162  ;;  %553 = vmatprep.subr.bf16.mxu0 (%p55_p11), %v652_v4  ;;  %561 = vmatprep.subr.bf16.mxu1 (%p55_p11), %v652_v4  ;;  %v602_v5 = vld [vmem:[%s800_s4 + $0x8] sm:$0xff] (%p55_p11)   ;;  %v604_v7 = vld [vmem:[%s800_s4] sm:$0xff] (%p55_p11)   ;;  %vm390_vm2 = vcmask (%p55_p11), 130048   ;;  %vm449_vm3 = vcmask (%p55_p11), 64512   ;;  %vm473_vm4 = vcmask (%p55_p11), 7168  }
  0x2f   :  { %554 = vmatpush3.bf16.msra.mxu0 (%p55_p11), %v601_v3  ;;  %557 = vmatprep.mubr.msk.bf16.mxu0 (%p55_p11), %vm653_vm0, %v652_v4  ;;  %v174_v8 = vld [vmem:[#allocation3] sm:$0xff] (%p55_p11)  ;;  %v173_v9 = vld [vmem:[#allocation2] sm:$0xff] (%p55_p11)  ;;  %v539_v53 = vld [vmem:[#allocation8] ss:$0 sm:$0xff] (%p55_p11) }
  0x30   :  { %562 = vmatpush3.bf16.msra.mxu1 (%p55_p11), %v602_v5  ;;  %555 = vmatprep.subr.bf16.mxu0 (%p55_p11), %v652_v4  ;;  %v181_v10 = vpack.c.bf16 (%p55_p11), %v174_v8, %v174_v8  ;;  %v176_v11 = vpack.c.bf16 (%p55_p11), %v173_v9, %v173_v9  ;;  %v605_v12 = vld [vmem:[%s803_s7 + $0x8] sm:$0xff] (%p55_p11)   ;;  %v606_v13 = vld [vmem:[%s803_s7] sm:$0xff] (%p55_p11)   ;;  %v175_v30 = vmul.f32 (%p55_p11), %v174_v8, %v173_v9  ;;  %s655_s7 = smov (%p55_p11), 96  }
  0x31   :  { %563 = vmatprep.subr.bf16.mxu1 (%p55_p11), %v652_v4  ;;  %565 = vmatprep.mubr.msk.bf16.mxu1 (%p55_p11), %vm653_vm0, %v652_v4  ;;  %v537_v14 = vld [vmem:[%s807_s11] ss:$0 sm:$0xff] (%p55_p11) }
  0x32   :  { %v607_v15 = vld [vmem:[%s805_s9] sm:$0xff] (%p55_p11)   ;;  %441 = vrot.lane.b32.xlu0 (%p55_p11), %v537_v14, %s654_s26 }
  0x33   :  { %556 = vmatpush3.bf16.msra.mxu0 %v603_v6  ;;  %v529_v18 = vld [vmem:[%s802_s6] ss:$0 sm:$0xff] }
  0x34   :  { %564 = vmatpush3.bf16.msra.mxu1 %v604_v7  ;;  %569 = vmatprep.subr.bf16.mxu0 %v652_v4  ;;  %v530_v32 = vld [vmem:[%s804_s8] ss:$0 sm:$0xff] }
  0x35   :  { %577 = vmatprep.subr.bf16.mxu1 %v652_v4  ;;  %v534_v42 = vld [vmem:[%s806_s10] ss:$0 sm:$0xff] }
  0x36   :  { %558 = vmatmul.mubr.msk.bf16.vlgmr.msra.gmra.mxu0 %vm198_vm1, %v181_v10  ;;  %v538_v46 = vld [vmem:[%s808_s12] ss:$0 sm:$0xff] }
  0x37   :  { %566 = vmatmul.mubr.msk.bf16.vlgmr.msra.gmra.mxu1 %vm198_vm1, %v176_v11  ;;  %573 = vmatprep.mubr.msk.bf16.mxu0 %vm653_vm0, %v652_v4 }
  0x38   :  { %579 = vmatprep.mubr.msk.bf16.mxu1 %vm653_vm0, %v652_v4  ;;  %570 = vmatpush3.bf16.msra.mxu0 %v605_v12 }
  0x39   :  { %571 = vmatprep.subr.bf16.mxu0 %v652_v4  ;;  %578 = vmatpush3.bf16.msra.mxu1 %v607_v15 }
  0x3c   :  { %572 = vmatpush3.bf16.msra.mxu0 %v606_v13 }
  0xa4   :  { %v442_v29 = vpop.permute.xlu0 %441 }
  0xa5   :  { %v444_v31 = vmul.f32 %v442_v29, %v175_v30 }
  0xa7   :  { %446 = vrot.lane.b32.xlu0 %v444_v31, %s655_s7 }
  0xf6   :  { %v236_v16 = vpop.f32.mrf.mxu0 }
  0xf7   :  { %v291_v17 = vpop.f32.mrf.mxu1 }
  0xf8   :  { %v292_v19 = vadd.f32 %v291_v17, %v236_v16  ;;  %v559_v20 = vpop.f32.mrf.mxu0 }
  0xf9   :  { %v567_v21 = vpop.f32.mrf.mxu1 }
  0xfa   :  { %v304_v22 = vadd.f32 %v529_v18, %v292_v19  ;;  %v239_v23 = vpop.f32.mrf.mxu0 }
  0xfb   :  { %v294_v24 = vpop.f32.mrf.mxu1 }
  0xfc   :  { %v305_v25 = vmax.f32 %v304_v22, 0.0  ;;  %v560_v26 = vpop.f32.mrf.mxu0 }
  0xfd   :  { %v568_v27 = vpop.f32.mrf.mxu1 }
  0xfe   :  { %v306_v28 = vpack.c.bf16 %v305_v25, %v305_v25 }
 0x100   :  { %574 = vmatmul.mubr.msk.bf16.vlgmr.msra.gmra.mxu0 %vm198_vm1, %v306_v28 }
 0x119   :  { %v447_v40 = vpop.permute.xlu0 %446 }
 0x11a   :  { %v450_v41 = vsel %vm449_vm3, %v447_v40, 0.0 }
 0x11b   :  { %451 = vadd.xlane.f32.xlu1 %v450_v41 }
 0x1a4   :  { %v452_v52 = vpop.xlane.xlu1 %451 }
 0x1c0   :  { %v367_v33 = vpop.f32.mrf.mxu0 }
 0x1c1   :  { %v368_v34 = vadd.f32 %v530_v32, %v367_v33 }
 0x1c2   :  { %v575_v35 = vpop.f32.mrf.mxu0 }
 0x1c3   :  { %v373_v36 = vmax.f32 %v368_v34, 0.0 }
 0x1c4   :  { %v370_v37 = vpop.f32.mrf.mxu0 }
 0x1c5   :  { %v374_v38 = vpack.c.bf16 %v373_v36, %v373_v36 }
 0x1c6   :  { %v576_v39 = vpop.f32.mrf.mxu0 }
 0x1c7   :  { %580 = vmatmul.mubr.msk.bf16.vlgmr.msra.gmra.mxu1 %vm390_vm2, %v374_v38 }
 0x287   :  { %v428_v43 = vpop.f32.mrf.mxu1 }
 0x288   :  { %v429_v44 = vadd.f32 %v534_v42, %v428_v43 }
 0x289   :  { %v581_v45 = vpop.f32.mrf.mxu1 }
 0x28a   :  { %v434_v47 = vmax.f32 %v429_v44, 0.0 }
 0x28b   :  { %v431_v48 = vpop.f32.mrf.mxu1 }
 0x28c   :  { %v460_v49 = vmul.f32 %v538_v46, %v434_v47 }
 0x28d   :  { %v582_v50 = vpop.f32.mrf.mxu1 }
 0x28e   :  { %v461_v51 = vsel %vm449_vm3, %v460_v49, 0.0 }
 0x28f   :  { %462 = vadd.xlane.f32.xlu1 %v461_v51 }
 0x318   :  { %v463_v54 = vpop.xlane.xlu1 %462 }
 0x319   :  { %v464_v55 = vadd.f32 %v463_v54, %v452_v52 }
 0x31b   :  { %v472_v56 = vadd.f32 %v539_v53, %v464_v55 }
 0x31d   :  { %474 = vst.msk [vmem:[%s809_s14] sm:$0xff] %vm473_vm4, %v472_v56 }
 0x31e   :  { %479 = vsyncmov [#allocation4] }
 0x321   :  { %s480_s16 = vpop.sfrf %479 }
 0x322   :  { %p540_p12 = scmp.ne.s32.totalorder %s480_s16, 0 }
 0x324   :  { %484 = shalt.err (%p540_p12)  }
 0x325   :  { %486 = vsyncmov [#allocation4 + $0x1] }
 0x328   :  { %s487_s12 = vpop.sfrf %486 }
 0x329   :  { %p541_p13 = scmp.ne.s32.totalorder %s487_s12, 0 }
 0x32b   :  { %491 = shalt.err (%p541_p13)  }

</bundles_post_ra>
